<compile_context>
chip_gen: v7x
topology: tpu7x:2x2x1
jax: 0.10.0
libtpu: 0.0.40
codegen_flags: <defaults>
</compile_context>

<pallas_src>
import functools

import jax
import jax.numpy as jnp
from jax.experimental import pallas as pl
from jax.experimental.pallas import tpu as pltpu


def _silu_f32(x):
    # f32 SiLU: sigmoid lands on the EUP slot, multiply on the VPU — both
    # effectively free next to the MXU matmuls (and v5e has no bf16 VPU/EUP).
    return x * jax.nn.sigmoid(x)


def _linear_silu(h_bf16, w, b):
    # bf16 x bf16 matmul on the MXU with f32 accumulation, f32 bias + SiLU
    # epilogue, then back to bf16 for the next MXU op.
    y = jnp.dot(h_bf16, w, preferred_element_type=jnp.float32)
    return _silu_f32(y + b).astype(jnp.bfloat16)


def _mlp_fused_kernel(x_ref, w_in, b_in, w_mid, b_mid, w_out, b_out,
                      w_z, b_z, o_ref):
    """Whole MLP per row tile; all weights resident in VMEM (grid = row tiles)."""
    h = _linear_silu(x_ref[...], w_in[...], b_in[...])
    for l in range(w_mid.shape[0]):          # 4 H->H layers, fully unrolled
        h = _linear_silu(h, w_mid[l], b_mid[l])
    h = _linear_silu(h, w_out[...], b_out[...])
    # zero_module(nn.Linear): zero at init but may be trained, so keep the
    # matmul for exact semantic parity with the PyTorch graph.
    out = jnp.dot(h, w_z[...], preferred_element_type=jnp.float32) + b_z[...]
    o_ref[...] = out.astype(o_ref.dtype)


def _mlp_streamed_kernel(x_ref, w_in, b_in, w_mid, b_mid, w_out, b_out,
                         w_z, b_z, o_ref, h_ref):
    """Single row tile; the grid iterates the 4 H->H layers so each HxH weight
    block is DMA'd (auto double-buffered) while the previous layer computes."""
    l = pl.program_id(0)

    @pl.when(l == 0)
    def _():
        h_ref[...] = _linear_silu(x_ref[...], w_in[...], b_in[...])

    # Middle layer l (weight block streamed for this grid step).
    h_ref[...] = _linear_silu(h_ref[...], w_mid[0], b_mid[0])

    @pl.when(l == pl.num_programs(0) - 1)
    def _():
        h = _linear_silu(h_ref[...], w_out[...], b_out[...])
        out = jnp.dot(h, w_z[...], preferred_element_type=jnp.float32) + b_z[...]
        o_ref[...] = out.astype(o_ref.dtype)


def init_params(key, cond_dim=512, inner_dim=1024, n_mid=4):
    """Synthetic params matching nn.Linear init, in the kernel's layout:
    weights (in, out) bf16, biases (1, out) f32, middle layers pre-stacked."""

    def linear(k, din, dout):
        kw, kb = jax.random.split(k)
        s = float(din) ** -0.5
        w = jax.random.uniform(kw, (din, dout), jnp.float32, -s, s)
        b = jax.random.uniform(kb, (1, dout), jnp.float32, -s, s)
        return w.astype(jnp.bfloat16), b

    keys = jax.random.split(key, n_mid + 2)
    w_in, b_in = linear(keys[0], cond_dim, inner_dim)
    mids = [linear(k, inner_dim, inner_dim) for k in keys[1:1 + n_mid]]
    w_out, b_out = linear(keys[-1], inner_dim, cond_dim)
    return {
        "w_in": w_in, "b_in": b_in,
        "w_mid": jnp.stack([w for w, _ in mids]),      # (n_mid, H, H) bf16
        "b_mid": jnp.stack([b for _, b in mids]),      # (n_mid, 1, H) f32
        "w_out": w_out, "b_out": b_out,
        # zero_linear: zero_module -> all parameters zeroed.
        "w_zero": jnp.zeros((cond_dim, cond_dim), jnp.bfloat16),
        "b_zero": jnp.zeros((1, cond_dim), jnp.float32),
    }


def _round_up(x, m):
    return ((x + m - 1) // m) * m


def _auto_tile_m(M):
    # bf16 activations pack 16 sublanes per vreg -> keep row tiles 16-aligned.
    M16 = _round_up(max(M, 16), 16)
    if M16 <= 512:
        # One row tile: weight fetch dominates here; don't duplicate weight
        # traffic across tiles (the streamed-layer plan is used instead).
        return M16
    # >=2 (even) row steps so both v7x TensorCores get balanced work,
    # <=256 rows per tile (full MXU width on v6e/v7x).
    steps = _round_up(pl.cdiv(M16, 256), 2)
    return _round_up(pl.cdiv(M16, steps), 16)


@functools.partial(jax.jit, static_argnames=("tile_m", "out_dtype"))
def text_clip_encoder_forward(encode_c, params, *, tile_m=None,
                              out_dtype=jnp.bfloat16):
    B, S, D = encode_c.shape
    n_mid, H, _ = params["w_mid"].shape
    M = B * S

    if tile_m is None:
        tile_m = _auto_tile_m(M)
    M_pad = _round_up(M, tile_m)
    n_row_tiles = M_pad // tile_m

    x2 = encode_c.reshape(M, D).astype(jnp.bfloat16)
    if M_pad != M:
        # NOTE: padded rows produce garbage through the SiLU chain; they are
        # sliced off below and the padded buffer must never be used directly.
        x2 = jnp.pad(x2, ((0, M_pad - M), (0, 0)))

    p = params
    args = (x2, p["w_in"], p["b_in"], p["w_mid"], p["b_mid"],
            p["w_out"], p["b_out"], p["w_zero"], p["b_zero"])

    # Grid-invariant blocks: constant index map + single buffering (default
    # 2-deep pipelining would only duplicate resident weights in VMEM).
    def const2(shape):
        return pl.BlockSpec(shape, lambda *_: (0, 0),
                            pipeline_mode=pl.Buffered(1))

    def const3(shape):
        return pl.BlockSpec(shape, lambda *_: (0, 0, 0),
                            pipeline_mode=pl.Buffered(1))

    edge = dict(
        w_in=const2(p["w_in"].shape), b_in=const2(p["b_in"].shape),
        w_out=const2(p["w_out"].shape), b_out=const2(p["b_out"].shape),
        w_zero=const2(p["w_zero"].shape), b_zero=const2(p["b_zero"].shape))

    if n_row_tiles == 1:
        # Fetch-bound regime: stream the four HxH weights along a layer grid
        # axis so their HBM fetch overlaps the per-layer matmuls instead of
        # sitting entirely in the prologue.
        grid = (n_mid,)
        in_specs = [
            const2((M_pad, D)),                              # x, resident
            edge["w_in"], edge["b_in"],
            pl.BlockSpec((1, H, H), lambda l: (l, 0, 0)),    # streamed weight
            pl.BlockSpec((1, 1, H), lambda l: (l, 0, 0)),    # streamed bias
            edge["w_out"], edge["b_out"],
            edge["w_zero"], edge["b_zero"],
        ]
        out_specs = pl.BlockSpec((M_pad, D), lambda l: (0, 0))
        kernel = _mlp_streamed_kernel
        scratch = [pltpu.VMEM((M_pad, H), jnp.bfloat16)]     # carried activation
        dim_sem = ("arbitrary",)                             # layer dep carried
    else:
        # Compute-bound regime: weights resident across the whole row grid,
        # rows sharded across TensorCores (megacore).
        grid = (n_row_tiles,)
        in_specs = [
            pl.BlockSpec((tile_m, D), lambda i: (i, 0)),
            edge["w_in"], edge["b_in"],
            const3(p["w_mid"].shape), const3(p["b_mid"].shape),
            edge["w_out"], edge["b_out"],
            edge["w_zero"], edge["b_zero"],
        ]
        out_specs = pl.BlockSpec((tile_m, D), lambda i: (i, 0))
        kernel = _mlp_fused_kernel
        scratch = []
        dim_sem = ("parallel",)

    # Advisory cost estimate so XLA can overlap the weight HBM fetch with
    # surrounding ops.
    flops = 2 * M_pad * (D * H + n_mid * H * H + H * D + D * D)
    transcendentals = M_pad * ((n_mid + 1) * H + D)   # one sigmoid per SiLU elem
    bytes_accessed = (x2.size * x2.dtype.itemsize
                      + sum(a.size * a.dtype.itemsize for a in args[1:])
                      + M_pad * D * jnp.dtype(out_dtype).itemsize)

    out = pl.pallas_call(
        kernel,
        out_shape=jax.ShapeDtypeStruct((M_pad, D), out_dtype),
        grid=grid,
        in_specs=in_specs,
        out_specs=out_specs,
        scratch_shapes=scratch,
        compiler_params=pltpu.CompilerParams(
            dimension_semantics=dim_sem,
            # Real sizes (D=512, H=1024, bf16) need <~12 MiB; 48 MiB keeps
            # headroom under v7x's 64 MiB physical VMEM.
            vmem_limit_bytes=48 * 1024 * 1024),
        cost_estimate=pl.CostEstimate(
            flops=flops,
            transcendentals=transcendentals,
            bytes_accessed=bytes_accessed),
    )(*args)

    return out[:M].reshape(B, S, D)


def _reference_forward(encode_c, params):
    """Pure-JAX reference with the same bf16-matmul / f32-accumulate recipe."""
    B, S, D = encode_c.shape
    h = encode_c.reshape(B * S, D).astype(jnp.bfloat16)

    def lin_silu(h, w, b):
        y = jnp.dot(h, w, preferred_element_type=jnp.float32) + b
        return _silu_f32(y).astype(jnp.bfloat16)

    h = lin_silu(h, params["w_in"], params["b_in"])
    for l in range(params["w_mid"].shape[0]):
        h = lin_silu(h, params["w_mid"][l], params["b_mid"][l])
    h = lin_silu(h, params["w_out"], params["b_out"])
    out = (jnp.dot(h, params["w_zero"], preferred_element_type=jnp.float32)
           + params["b_zero"])
    return out.reshape(B, S, D)


if __name__ == "__main__":
    # Small shapes consistent with the module (real module: cond_dim=512,
    # inner=1024, seq=77; feature dims scaled down here).
    COND_DIM, INNER_DIM = 128, 256

    key = jax.random.PRNGKey(0)
    key, kp, kx = jax.random.split(key, 3)
    params = init_params(kp, COND_DIM, INNER_DIM)

    def check(B, S, prm):
        kxl = jax.random.fold_in(kx, B * 1000 + S)
        x = jax.random.normal(kxl, (B, S, COND_DIM), jnp.float32)
        out = jax.block_until_ready(text_clip_encoder_forward(x, prm))
        assert out.shape == (B, S, COND_DIM)
        ref = _reference_forward(x, prm)
        err = float(jnp.max(jnp.abs(out.astype(jnp.float32) - ref)))
        assert jnp.allclose(out.astype(jnp.float32), ref,
                            atol=2e-2, rtol=2e-2), err

    # 1) Module-faithful forward (zero_linear zero-initialised), small M:
    #    exercises the streamed-layer (single row tile) plan.
    check(2, 8, params)

    # 2) Non-zero final linear so the whole fused chain's numerics are
    #    actually exercised (zero_linear would otherwise hide differences).
    key, kz1, kz2 = jax.random.split(key, 3)
    sc = float(COND_DIM) ** -0.5
    params_nz = dict(params)
    params_nz["w_zero"] = jax.random.uniform(
        kz1, (COND_DIM, COND_DIM), jnp.float32, -sc, sc).astype(jnp.bfloat16)
    params_nz["b_zero"] = jax.random.uniform(
        kz2, (1, COND_DIM), jnp.float32, -sc, sc)
    check(2, 8, params_nz)

    # 3) Larger row count (B=9, S=77 -> M=693): exercises the multi-tile
    #    resident-weight plan, row padding, and the even-step tiling.
    check(9, 77, params_nz)

    # TODO(synk): get_clip() (clip_pred_conv Conv1d stack + clip_matcher_) is
    # not part of forward() and is not implemented here.
    print("KERNEL_OK")
</pallas_src>

<mosaic_0001>
module attributes {stable_mosaic.version = 11 : i64} {
  func.func @_mlp_streamed_kernel(%arg0: i32, %arg1: memref<16x128xbf16, #tpu.memory_space<vmem>>, %arg2: memref<128x256xbf16, #tpu.memory_space<vmem>>, %arg3: memref<1x256xf32, #tpu.memory_space<vmem>>, %arg4: memref<1x256x256xbf16, #tpu.memory_space<vmem>>, %arg5: memref<1x1x256xf32, #tpu.memory_space<vmem>>, %arg6: memref<256x128xbf16, #tpu.memory_space<vmem>>, %arg7: memref<1x128xf32, #tpu.memory_space<vmem>>, %arg8: memref<128x128xbf16, #tpu.memory_space<vmem>>, %arg9: memref<1x128xf32, #tpu.memory_space<vmem>>, %arg10: memref<16x128xbf16, #tpu.memory_space<vmem>>, %arg11: memref<16x256xbf16, #tpu.memory_space<vmem>>) attributes {dimension_semantics = [#tpu.dimension_semantics<arbitrary>], iteration_bounds = array<i64: 4>, scalar_prefetch = 0 : i64, scratch_operands = 1 : i64, tpu.core_type = #tpu.core_type<tc>, window_params = [{pipeline_mode = #tpu.pipeline_mode<synchronous>, transform_indices = @transform_0, window_bounds = array<i64: 16, 128>}, {pipeline_mode = #tpu.pipeline_mode<synchronous>, transform_indices = @transform_1, window_bounds = array<i64: 128, 256>}, {pipeline_mode = #tpu.pipeline_mode<synchronous>, transform_indices = @transform_2, window_bounds = array<i64: 1, 256>}, {transform_indices = @transform_3, window_bounds = array<i64: 1, 256, 256>}, {transform_indices = @transform_4, window_bounds = array<i64: 1, 1, 256>}, {pipeline_mode = #tpu.pipeline_mode<synchronous>, transform_indices = @transform_5, window_bounds = array<i64: 256, 128>}, {pipeline_mode = #tpu.pipeline_mode<synchronous>, transform_indices = @transform_6, window_bounds = array<i64: 1, 128>}, {pipeline_mode = #tpu.pipeline_mode<synchronous>, transform_indices = @transform_7, window_bounds = array<i64: 128, 128>}, {pipeline_mode = #tpu.pipeline_mode<synchronous>, transform_indices = @transform_8, window_bounds = array<i64: 1, 128>}, {pipeline_mode = #tpu.pipeline_mode<synchronous>, transform_indices = @transform_9, window_bounds = array<i64: 16, 128>}]} {
    %c0_i32 = arith.constant 0 : i32
    %0 = arith.cmpi eq, %arg0, %c0_i32 : i32
    %1 = arith.extui %0 : i1 to i32
    %c0_i32_0 = arith.constant 0 : i32
    %2 = arith.cmpi ne, %1, %c0_i32_0 : i32
    scf.if %2 {
      %c0_12 = arith.constant 0 : index
      %c0_13 = arith.constant 0 : index
      %22 = vector.load %arg1[%c0_12, %c0_13] : memref<16x128xbf16, #tpu.memory_space<vmem>>, vector<16x128xbf16>
      %c0_14 = arith.constant 0 : index
      %c0_15 = arith.constant 0 : index
      %23 = vector.load %arg2[%c0_14, %c0_15] : memref<128x256xbf16, #tpu.memory_space<vmem>>, vector<128x256xbf16>
      %c0_16 = arith.constant 0 : index
      %c0_17 = arith.constant 0 : index
      %24 = vector.load %arg3[%c0_16, %c0_17] : memref<1x256xf32, #tpu.memory_space<vmem>>, vector<1x256xf32>
      %cst_18 = arith.constant dense<0.000000e+00> : vector<16x256xf32>
      %25 = tpu.matmul %22, %23, %cst_18 {dimension_numbers = #tpu.dot_dimension_numbers<[1], [0], [0], [1], [0, 0, 1, 1], [], []>} : vector<16x128xbf16>, vector<128x256xbf16>, vector<16x256xf32> -> vector<16x256xf32>
      %26 = vector.broadcast %24 : vector<1x256xf32> to vector<16x256xf32>
      %27 = arith.addf %25, %26 : vector<16x256xf32>
      %28 = arith.negf %27 : vector<16x256xf32>
      %29 = math.exp %28 : vector<16x256xf32>
      %cst_19 = arith.constant 1.000000e+00 : f32
      %30 = vector.broadcast %cst_19 : f32 to vector<16x256xf32>
      %31 = arith.addf %30, %29 : vector<16x256xf32>
      %32 = arith.divf %30, %31 : vector<16x256xf32>
      %33 = arith.mulf %27, %32 : vector<16x256xf32>
      %34 = arith.truncf %33 : vector<16x256xf32> to vector<16x256xbf16>
      %c0_20 = arith.constant 0 : index
      %c0_21 = arith.constant 0 : index
      %35 = vector.load %arg11[%c0_20, %c0_21] : memref<16x256xbf16, #tpu.memory_space<vmem>>, vector<16x256xbf16>
      tpu.vector_store %arg11[%c0_20, %c0_21], %34 {strides = array<i32>} : memref<16x256xbf16, #tpu.memory_space<vmem>>, vector<16x256xbf16>,
    } else {
    }
    %c0 = arith.constant 0 : index
    %c0_1 = arith.constant 0 : index
    %3 = vector.load %arg11[%c0, %c0_1] : memref<16x256xbf16, #tpu.memory_space<vmem>>, vector<16x256xbf16>
    %c0_2 = arith.constant 0 : index
    %c0_3 = arith.constant 0 : index
    %c0_4 = arith.constant 0 : index
    %4 = vector.load %arg4[%c0_2, %c0_3, %c0_4] : memref<1x256x256xbf16, #tpu.memory_space<vmem>>, vector<1x256x256xbf16>
    %5 = vector.shape_cast %4 : vector<1x256x256xbf16> to vector<256x256xbf16>
    %c0_5 = arith.constant 0 : index
    %c0_6 = arith.constant 0 : index
    %c0_7 = arith.constant 0 : index
    %6 = vector.load %arg5[%c0_5, %c0_6, %c0_7] : memref<1x1x256xf32, #tpu.memory_space<vmem>>, vector<1x1x256xf32>
    %7 = vector.shape_cast %6 : vector<1x1x256xf32> to vector<1x256xf32>
    %cst = arith.constant dense<0.000000e+00> : vector<16x256xf32>
    %8 = tpu.matmul %3, %5, %cst {dimension_numbers = #tpu.dot_dimension_numbers<[1], [0], [0], [1], [0, 0, 1, 1], [], []>} : vector<16x256xbf16>, vector<256x256xbf16>, vector<16x256xf32> -> vector<16x256xf32>
    %9 = vector.broadcast %7 : vector<1x256xf32> to vector<16x256xf32>
    %10 = arith.addf %8, %9 : vector<16x256xf32>
    %11 = arith.negf %10 : vector<16x256xf32>
    %12 = math.exp %11 : vector<16x256xf32>
    %cst_8 = arith.constant 1.000000e+00 : f32
    %13 = vector.broadcast %cst_8 : f32 to vector<16x256xf32>
    %14 = arith.addf %13, %12 : vector<16x256xf32>
    %15 = arith.divf %13, %14 : vector<16x256xf32>
    %16 = arith.mulf %10, %15 : vector<16x256xf32>
    %17 = arith.truncf %16 : vector<16x256xf32> to vector<16x256xbf16>
    %c0_9 = arith.constant 0 : index
    %c0_10 = arith.constant 0 : index
    %18 = vector.load %arg11[%c0_9, %c0_10] : memref<16x256xbf16, #tpu.memory_space<vmem>>, vector<16x256xbf16>
    tpu.vector_store %arg11[%c0_9, %c0_10], %17 {strides = array<i32>} : memref<16x256xbf16, #tpu.memory_space<vmem>>, vector<16x256xbf16>,
    %c3_i32 = arith.constant 3 : i32
    %19 = arith.cmpi eq, %arg0, %c3_i32 : i32
    %20 = arith.extui %19 : i1 to i32
    %c0_i32_11 = arith.constant 0 : i32
    %21 = arith.cmpi ne, %20, %c0_i32_11 : i32
    scf.if %21 {
      %c0_12 = arith.constant 0 : index
      %c0_13 = arith.constant 0 : index
      %22 = vector.load %arg11[%c0_12, %c0_13] : memref<16x256xbf16, #tpu.memory_space<vmem>>, vector<16x256xbf16>
      %c0_14 = arith.constant 0 : index
      %c0_15 = arith.constant 0 : index
      %23 = vector.load %arg6[%c0_14, %c0_15] : memref<256x128xbf16, #tpu.memory_space<vmem>>, vector<256x128xbf16>
      %c0_16 = arith.constant 0 : index
      %c0_17 = arith.constant 0 : index
      %24 = vector.load %arg7[%c0_16, %c0_17] : memref<1x128xf32, #tpu.memory_space<vmem>>, vector<1x128xf32>
      %cst_18 = arith.constant dense<0.000000e+00> : vector<16x128xf32>
      %25 = tpu.matmul %22, %23, %cst_18 {dimension_numbers = #tpu.dot_dimension_numbers<[1], [0], [0], [1], [0, 0, 1, 1], [], []>} : vector<16x256xbf16>, vector<256x128xbf16>, vector<16x128xf32> -> vector<16x128xf32>
      %26 = vector.broadcast %24 : vector<1x128xf32> to vector<16x128xf32>
      %27 = arith.addf %25, %26 : vector<16x128xf32>
      %28 = arith.negf %27 : vector<16x128xf32>
      %29 = math.exp %28 : vector<16x128xf32>
      %cst_19 = arith.constant 1.000000e+00 : f32
      %30 = vector.broadcast %cst_19 : f32 to vector<16x128xf32>
      %31 = arith.addf %30, %29 : vector<16x128xf32>
      %32 = arith.divf %30, %31 : vector<16x128xf32>
      %33 = arith.mulf %27, %32 : vector<16x128xf32>
      %34 = arith.truncf %33 : vector<16x128xf32> to vector<16x128xbf16>
      %c0_20 = arith.constant 0 : index
      %c0_21 = arith.constant 0 : index
      %35 = vector.load %arg8[%c0_20, %c0_21] : memref<128x128xbf16, #tpu.memory_space<vmem>>, vector<128x128xbf16>
      %cst_22 = arith.constant dense<0.000000e+00> : vector<16x128xf32>
      %36 = tpu.matmul %34, %35, %cst_22 {dimension_numbers = #tpu.dot_dimension_numbers<[1], [0], [0], [1], [0, 0, 1, 1], [], []>} : vector<16x128xbf16>, vector<128x128xbf16>, vector<16x128xf32> -> vector<16x128xf32>
      %c0_23 = arith.constant 0 : index
      %c0_24 = arith.constant 0 : index
      %37 = vector.load %arg9[%c0_23, %c0_24] : memref<1x128xf32, #tpu.memory_space<vmem>>, vector<1x128xf32>
      %38 = vector.broadcast %37 : vector<1x128xf32> to vector<16x128xf32>
      %39 = arith.addf %36, %38 : vector<16x128xf32>
      %40 = arith.truncf %39 : vector<16x128xf32> to vector<16x128xbf16>
      %c0_25 = arith.constant 0 : index
      %c0_26 = arith.constant 0 : index
      %41 = vector.load %arg10[%c0_25, %c0_26] : memref<16x128xbf16, #tpu.memory_space<vmem>>, vector<16x128xbf16>
      tpu.vector_store %arg10[%c0_25, %c0_26], %40 {strides = array<i32>} : memref<16x128xbf16, #tpu.memory_space<vmem>>, vector<16x128xbf16>,
    } else {
    }
    return
  }
  func.func @transform_0(%arg0: i32) -> (i32, i32) {
    %c0_i32 = arith.constant 0 : i32
    %c0_i32_0 = arith.constant 0 : i32
    %c0_i32_1 = arith.constant 0 : i32
    return %c0_i32, %c0_i32_0 : i32, i32
  }
  func.func @transform_1(%arg0: i32) -> (i32, i32) {
    %c0_i32 = arith.constant 0 : i32
    %c0_i32_0 = arith.constant 0 : i32
    %c0_i32_1 = arith.constant 0 : i32
    return %c0_i32, %c0_i32_0 : i32, i32
  }
  func.func @transform_2(%arg0: i32) -> (i32, i32) {
    %c0_i32 = arith.constant 0 : i32
    %c0_i32_0 = arith.constant 0 : i32
    %c0_i32_1 = arith.constant 0 : i32
    return %c0_i32, %c0_i32_0 : i32, i32
  }
  func.func @transform_3(%arg0: i32) -> (i32, i32, i32) {
    %c0_i32 = arith.constant 0 : i32
    %c0_i32_0 = arith.constant 0 : i32
    %c0_i32_1 = arith.constant 0 : i32
    return %arg0, %c0_i32, %c0_i32_0 : i32, i32, i32
  }
  func.func @transform_4(%arg0: i32) -> (i32, i32, i32) {
    %c0_i32 = arith.constant 0 : i32
    %c0_i32_0 = arith.constant 0 : i32
    %c0_i32_1 = arith.constant 0 : i32
    return %arg0, %c0_i32, %c0_i32_0 : i32, i32, i32
  }
  func.func @transform_5(%arg0: i32) -> (i32, i32) {
    %c0_i32 = arith.constant 0 : i32
    %c0_i32_0 = arith.constant 0 : i32
    %c0_i32_1 = arith.constant 0 : i32
    return %c0_i32, %c0_i32_0 : i32, i32
  }
  func.func @transform_6(%arg0: i32) -> (i32, i32) {
    %c0_i32 = arith.constant 0 : i32
    %c0_i32_0 = arith.constant 0 : i32
    %c0_i32_1 = arith.constant 0 : i32
    return %c0_i32, %c0_i32_0 : i32, i32
  }
  func.func @transform_7(%arg0: i32) -> (i32, i32) {
    %c0_i32 = arith.constant 0 : i32
    %c0_i32_0 = arith.constant 0 : i32
    %c0_i32_1 = arith.constant 0 : i32
    return %c0_i32, %c0_i32_0 : i32, i32
  }
  func.func @transform_8(%arg0: i32) -> (i32, i32) {
    %c0_i32 = arith.constant 0 : i32
    %c0_i32_0 = arith.constant 0 : i32
    %c0_i32_1 = arith.constant 0 : i32
    return %c0_i32, %c0_i32_0 : i32, i32
  }
  func.func @transform_9(%arg0: i32) -> (i32, i32) {
    %c0_i32 = arith.constant 0 : i32
    %c0_i32_0 = arith.constant 0 : i32
    %c0_i32_1 = arith.constant 0 : i32
    return %c0_i32, %c0_i32_0 : i32, i32
  }
}

</mosaic_0001>

<bundles_post_ra>
// kernel: text_clip_encoder_forward.1
= control target key start
LH: loop header
LB: loop body
LE: loop exit
PB: predicated region body
PF: predicated region fallthrough
CT: control target
= control target key end

     0   :  { %s2234_s0 = inlined_call_operand.vmem [shape: bf16[16,128], index: 0, kind: input, shape index: {}]   ;;  %s2235_s1 = inlined_call_operand.hbm [shape: bf16[128,256], index: 1, kind: input, shape index: {}]   ;;  %s2236_s2 = inlined_call_operand.vmem [shape: f32[1,256], index: 2, kind: input, shape index: {}]   ;;  %s2237_s3 = inlined_call_operand.hbm [shape: bf16[4,256,256], index: 3, kind: input, shape index: {}]   ;;  %s2238_s4 = inlined_call_operand.vmem [shape: f32[4,1,256], index: 4, kind: input, shape index: {}]   ;;  %s2239_s5 = inlined_call_operand.hbm [shape: bf16[256,128], index: 5, kind: input, shape index: {}]   ;;  %s2240_s6 = inlined_call_operand.vmem [shape: f32[1,128], index: 6, kind: input, shape index: {}]   ;;  %s2241_s7 = inlined_call_operand.hbm [shape: bf16[128,128], index: 7, kind: input, shape index: {}]   ;;  %s2242_s8 = inlined_call_operand.vmem [shape: f32[1,128], index: 8, kind: input, shape index: {}]   ;;  %s2243_s9 = inlined_call_operand.hbm [shape: bf16[16,128], index: 9, kind: output, shape index: {}]  }
   0x1   :  { %2253 = sst [smem:[#allocation19_spill]] %s2239_s5 }
   0x2   :  { %2254 = sst [smem:[#allocation20_spill]] %s2240_s6 }
   0x3   :  { %2255 = sst [smem:[#allocation21_spill]] %s2242_s8 }
   0x4   :  { %2256 = sst [smem:[#allocation22_spill]] %s2243_s9 }
   0x5   :  { %14 = vsyncpa [#allocation4], 0 }
   0x6   :  { %15 = vsyncpa [#allocation7], 0 }
   0x7   :  { %17 = vsyncpa [#allocation7 + $0x1], 0 }
   0x8   :  { %18 = vsyncpa [#allocation10], 0 }
   0x9   :  { %19 = vsyncpa [#allocation5], 0  ;;  %s1944_s30 = smov 0   ;;  %s1946_s10 = smov 0  }
   0xa   :  { %s1948_s11 = smov 0   ;;  %s1950_s12 = smov 0  }
   0xb LB: > { %s1963_s13 = sadd.s32 4294967295, %s1878_s12   ;;  %s1966_s14 = sadd.s32 1, %s1878_s12   ;;  %s1878_s12 = sphi %s1950_s12, %s2281_s12   ;;  %s1874_s11 = sphi %s1948_s11, %s2285_s11   ;;  %s1870_s10 = sphi %s1946_s10, %s2284_s10   ;;  %s1866_s30 = sphi %s1944_s30, %s2283_s30  }
   0xc   : > { %2257 = sst [smem:[#allocation17_spill]] %s1966_s14  ;;  %s92_s15 = ssub.s32 %s1878_s12, %s1966_s14 }
   0xd   : > { %s95_s16 = sadd.s32 1, %s1874_s11  ;;  %p93_p0 = scmp.eq.s32.totalorder %s92_s15, 0 }
   0xe   : > { %p102_p1 = scmp.ne.s32.totalorder %s1874_s11, %s1870_s10  ;;  %p103_p2 = scmp.eq.s32.totalorder %s1878_s12, 0 }
   0xf   : > { %p108_p3 = scmp.ne.s32.totalorder %s1870_s10, %s1866_s30  ;;  %p2244_p5 = scmp.eq.s32.totalorder %s1963_s13, 0 }
  0x10   : > { %s1976_s17 = scalar_select %p93_p0, %s1874_s11, %s95_s16  }
  0x11   : > { %p1978_p4 = por %p103_p2, %p102_p1  ;;  %p1299_p6 = scmp.ge.s32.totalorder %s1878_s12, 1 }
  0x12   : > { %2258 = sst [smem:[#allocation18_spill]] %s1976_s17  ;;  %p250_p7 = scmp.lt.s32.totalorder %s1878_s12, 5 }
  0x13   : > { %p1987_p8 = por %p2244_p5, %p108_p3  ;;  %s1880_s21 = smov [#allocation8]  }
  0x14   : > { %p1992_p10 = pnand %p1299_p6, %p250_p7  ;;  %s281_s22 = sshll.u32 %s1880_s21, 4  ;;  %s282_s22 = int_to_ptr.vmem [resolvable:$true] %s281_s22 }
  0x15   : > { %s2260_s19 = scalar_select %p1987_p8, 1, 0 }
  0x16   : > { %s2261_s20 = scalar_select %p1992_p10, 1, 0 }
  0x17   : > { %p1483_p11 = pneg %p1992_p10  ;;  %p1500_p13 = scmp.lt.s32.totalorder %s1878_s12, 4 }
  0x18   : > { %s2264_s5 = sld [smem:[#allocation19_spill]] }
  0x19   : > { %p2000_p12 = pnand %p1483_p11, %p2244_p5  ;;  %p2007_p0 = pnand %p1500_p13, %p1978_p4 }
  0x1b   : > { %s2263_s24 = scalar_select %p2007_p0, 1, 0 }
  0x1c   : > { %p2019_p2 = pneg %p2000_p12 }
  0x1e   : > { %s1688_s27 = scalar_lea.hbm %s2264_s5, 2048 }
  0x1f   : > { %p1689_p1 = scmp.ne.s32.totalorder %s2264_s5, %s1688_s27  ;;  %p1695_p6 = scmp.lt.u32.totalorder %s1688_s27, %s2264_s5 }
  0x21   : > { %p1691_p3 = pnand %p2019_p2, %p1689_p1 }
  0x23   : > { %p1692_p4 = pneg %p1691_p3 }
  0x25   : > { %p1697_p7 = pnand %p1695_p6, %p1692_p4 }
  0x27   : > { %1700 = shalt.err (!%p1697_p7)
}
  0x28   : > { %s1701_s18 = scalar_lea.vmem %s282_s22, 2048  ;;  %p1709_p5 = scmp.lt.s32.totalorder %s282_s22, %s282_s22 }
  0x29   : > { %p1702_p11 = scmp.ne.s32.totalorder %s282_s22, %s1701_s18  ;;  %p1710_p8 = scmp.lt.s32.totalorder %s1701_s18, %s1701_s18 }
  0x2b   : > { %p1704_p13 = pnand %p1702_p11, %p2019_p2  ;;  %p1711_p10 = por %p1710_p8, %p1709_p5 }
  0x2d   : > { %p1705_p9 = pneg %p1704_p13 }
  0x2f   : > { %p1712_p0 = pnand %p1711_p10, %p1705_p9 }
  0x31   : > { %1715 = shalt.err (!%p1712_p0)
}
  0x32   : > { %s2251_s21 = smov 64   ;;  %s2252_s25 = smov 4  }
  0x33   : > { %1489 = dma.hbm_to_vmem [thread:$0]  (!%p2000_p12), %s2264_s5, 2048, %s282_s22, [#allocation7], %s2251_s21, %s2251_s21, %s2252_s25  }
  0x34   : > { %s1883_s28 = smov [#allocation3]   ;;  %s1716_s18 = scalar_lea.hbm %s2235_s1, 2048 }
  0x35   : > { %s265_s29 = sshll.u32 %s1883_s28, 4  ;;  %p1717_p5 = scmp.ne.s32.totalorder %s2235_s1, %s1716_s18  ;;  %s266_s29 = int_to_ptr.vmem [resolvable:$true] %s265_s29 }
  0x36   : > { %p1723_p10 = scmp.lt.u32.totalorder %s1716_s18, %s2235_s1 }
  0x37   : > { %p1719_p8 = pnand %p1717_p5, %p2019_p2 }
  0x39   : > { %p1720_p9 = pneg %p1719_p8 }
  0x3b   : > { %p1725_p0 = pnand %p1723_p10, %p1720_p9 }
  0x3d   : > { %1728 = shalt.err (!%p1725_p0)
}
  0x3e   : > { %s1729_s22 = scalar_lea.vmem %s266_s29, 2048  ;;  %p1737_p6 = scmp.lt.s32.totalorder %s266_s29, %s266_s29 }
  0x3f   : > { %p1730_p1 = scmp.ne.s32.totalorder %s266_s29, %s1729_s22  ;;  %p1738_p7 = scmp.lt.s32.totalorder %s1729_s22, %s1729_s22 }
  0x41   : > { %p1732_p3 = pnand %p1730_p1, %p2019_p2  ;;  %p1739_p11 = por %p1738_p7, %p1737_p6 }
  0x43   : > { %p1733_p4 = pneg %p1732_p3 }
  0x45   : > { %p1740_p13 = pnand %p1739_p11, %p1733_p4 }
  0x47   : > { %1743 = shalt.err (!%p1740_p13)
}
  0x48   : > { %s1884_s14 = smov 128   ;;  %s1885_s8 = smov 8  }
  0x49   : > { %1486 = dma.hbm_to_vmem [thread:$0]  (!%p2000_p12), %s2235_s1, 2048, %s266_s29, [#allocation4], %s1884_s14, %s1884_s14, %s1885_s8  }
  0x4a   : > { %s314_s26 = sand.u32 1, %s1878_s12   ;;  %s1886_s27 = smov [#allocation9]  }
  0x4b   : > { %s297_s28 = sshll.u32 %s1886_s27, 4  ;;  %s316_s15 = sand.u32 1, %s1874_s11   ;;  %s298_s28 = int_to_ptr.vmem [resolvable:$true] %s297_s28 }
  0x4c   : > { %s1744_s22 = scalar_lea.hbm %s2241_s7, 1024 }
  0x4d   : > { %p1745_p5 = scmp.ne.s32.totalorder %s2241_s7, %s1744_s22  ;;  %p1751_p10 = scmp.lt.u32.totalorder %s1744_s22, %s2241_s7 }
  0x4f   : > { %p1747_p8 = pnand %p1745_p5, %p2019_p2 }
  0x51   : > { %p1748_p9 = pneg %p1747_p8 }
  0x53   : > { %p1753_p0 = pnand %p1751_p10, %p1748_p9 }
  0x55   : > { %1756 = shalt.err (!%p1753_p0)
}
  0x56   : > { %s1757_s29 = scalar_lea.vmem %s298_s28, 1024  ;;  %p1765_p6 = scmp.lt.s32.totalorder %s298_s28, %s298_s28 }
  0x57   : > { %p1758_p1 = scmp.ne.s32.totalorder %s298_s28, %s1757_s29  ;;  %p1766_p7 = scmp.lt.s32.totalorder %s1757_s29, %s1757_s29 }
  0x59   : > { %p1760_p3 = pnand %p1758_p1, %p2019_p2  ;;  %p1767_p11 = por %p1766_p7, %p1765_p6 }
  0x5b   : > { %p1761_p4 = pneg %p1760_p3 }
  0x5d   : > { %p1768_p13 = pnand %p1767_p11, %p1761_p4 }
  0x5f   : > { %1771 = shalt.err (!%p1768_p13)
}
  0x60   : > { %s2266_s21 = smov 4   ;;  %s2267_s25 = smov 64  }
  0x61   : > { %1492 = dma.hbm_to_vmem [thread:$0]  (!%p2000_p12), %s2241_s7, 1024, %s298_s28, [#allocation10], %s2267_s25, %s2267_s25, %s2266_s21  }
  0x62   : > { %s1304_s30 = sshll.u32 %s316_s15, 8  ;;  %s1406_s9 = sshll.u32 %s1878_s12, 12 }
  0x63   : > { %s2086_s16 = scalar_lea.hbm %s2237_s3, %s1406_s9  ;;  %s318_s23 = scalar_lea.vmem [#allocation6], %s1304_s30 }
  0x64   : > { %s325_s18 = sshll.u32 %s318_s23, 4  ;;  %s2090_s22 = scalar_lea.sflag [#allocation7], %s314_s26  ;;  %s2088_s18 = int_to_ptr.vmem [resolvable:$true] %s325_s18 }
  0x65   : > { %s1772_s29 = scalar_lea.hbm %s2086_s16, 4096  ;;  %p2268_p12 = scmp.ne.s32.totalorder %s2263_s24, 0 }
  0x66   : > { %p1773_p2 = scmp.ne.s32.totalorder %s2086_s16, %s1772_s29  ;;  %s1777_s15 = scalar_lea.hbm %s2237_s3, 16384 }
  0x67   : > { %p1774_p5 = pneg %p2268_p12  ;;  %p1778_p10 = scmp.lt.u32.totalorder %s2086_s16, %s2237_s3 }
  0x68   : > { %p1779_p0 = scmp.lt.u32.totalorder %s1777_s15, %s1772_s29  ;;  %p1781_p3 = scmp.lt.u32.totalorder %s1772_s29, %s2086_s16 }
  0x69   : > { %p1775_p8 = pnand %p1774_p5, %p1773_p2 }
  0x6a   : > { %p1780_p1 = por %p1779_p0, %p1778_p10 }
  0x6b   : > { %p1776_p9 = pneg %p1775_p8 }
  0x6c   : > { %p1782_p4 = por %p1781_p3, %p1780_p1 }
  0x6e   : > { %p1783_p6 = pnand %p1782_p4, %p1776_p9 }
  0x70   : > { %1786 = shalt.err (!%p1783_p6)
}
  0x71   : > { %s1787_s26 = scalar_lea.vmem %s2088_s18, 4096  ;;  %s1887_s5 = smov [#allocation6]  }
  0x72   : > { %p1788_p7 = scmp.ne.s32.totalorder %s2088_s18, %s1787_s26  ;;  %s1792_s6 = sshll.u32 %s1887_s5, 4  ;;  %s1793_s6 = int_to_ptr.vmem [resolvable:$false] %s1792_s6 }
  0x73   : > { %s1794_s30 = scalar_lea.vmem %s1793_s6, 8192  ;;  %p1795_p2 = scmp.lt.s32.totalorder %s2088_s18, %s1793_s6 }
  0x74   : > { %p1790_p11 = pnand %p1788_p7, %p1774_p5  ;;  %p1796_p8 = scmp.lt.s32.totalorder %s1794_s30, %s1787_s26 }
  0x76   : > { %p1791_p13 = pneg %p1790_p11  ;;  %p1797_p10 = por %p1796_p8, %p1795_p2 }
  0x78   : > { %p1798_p0 = pnand %p1797_p10, %p1791_p13 }
  0x7a   : > { %1801 = shalt.err (!%p1798_p0)
}
  0x7b   : > { %1496 = dma.hbm_to_vmem [thread:$0]  (!%p2268_p12), %s2086_s16, 4096, %s2088_s18, %s2090_s22, %s1884_s14, %s1884_s14, %s1885_s8  }
  0x7c   : > { %p2269_p5 = scmp.ne.s32.totalorder %s2261_s20, 0 }
  0x7d   : > { %p2270_p9 = scmp.eq.s32.totalorder (!%p2269_p5), %s1963_s13, 0 }
  0x7e   : > { %344 = sbr.rel (%p2269_p5) target bundleno = 1249 (0x4e1), region = 56 }
  0x85   : > { %1845 = dma.done.wait (%p2270_p9), [#allocation4], 2048   ;;  %p2271_p1 = pmov %p2270_p9 }
  0x86   : > { %s350_s24 = sand.u32 1, %s1963_s13   ;;  %s352_s9 = sand.u32 1, %s1870_s10  }
  0x87   : > { %1847 = vsyncadd (%p2271_p1), [#allocation4], 4294965248  ;;  %s1309_s17 = sshll.u32 %s352_s9, 8  ;;  %s351_s27 = scalar_lea.sflag [#allocation7], %s350_s24 }
  0x88   : > { %s2129_s23 = scalar_lea.vmem [#allocation6], %s1309_s17  ;;  %p2272_p3 = scmp.ne.s32.totalorder %s2260_s19, 0 }
  0x8a   : > { %1849 = dma.done.wait (%p2272_p3), %s351_s27, 4096  }
  0x8b   : > { %1851 = vsyncadd (%p2272_p3), %s351_s27, 4294963200  ;;  %p2273_p12 = pmov %p2271_p1 }
  0x8c   : > { %p2274_p4 = pmov %p2271_p1 }
  0x8d   : > { %1853 = dma.done.wait (%p2273_p12), [#allocation7], 2048  }
  0x8e   : > { %1855 = vsyncadd (%p2274_p4), [#allocation7], 4294965248  ;;  %p2275_p6 = pmov %p2271_p1 }
  0x8f   : > { %p2276_p7 = pmov %p2271_p1 }
  0x90   : > { %1857 = dma.done.wait (%p2275_p6), [#allocation10], 1024  }
  0x91   : > { %1859 = vsyncadd (%p2276_p7), [#allocation10], 4294966272  ;;  %p396_p11 = scmp.lt.s32.totalorder %s1963_s13, 3  ;;  %p2277_p13 = scmp.ne.s32.totalorder %s1963_s13, 0 }
  0x92   : > { %v1551_v0 = vld [vmem:[#allocation3 + $0x4] ss:$8 sps:$4 sm:$0xff] (!%p2277_p13)   ;;  %v1553_v1 = vld [vmem:[#allocation3] ss:$8 sps:$4 sm:$0xff] (!%p2277_p13)   ;;  %v1888_v2 = vmov (!%p2277_p13), 0   ;;  %v1575_v17 = vld [vmem:[%s2234_s0] sm:$0xff] (!%p2277_p13)   ;;  %v425_v18 = vlaneseq (!%p2277_p13) }
  0x93   : > { %s397_s20 = scalar_select %p396_p11, %s1963_s13, 3 }
  0x94   : > { %404 = sbr.rel (%p2277_p13) target bundleno = 428 (0x1ac), region = 76  ;;  %553 = vmatprep.mubr.bf16.mxu0 (!%p2277_p13), %v1888_v2  ;;  %521 = vmatprep.subr.bf16.mxu0 (!%p2277_p13), %v1551_v0  ;;  %v1554_v3 = vld [vmem:[#allocation3 + $0x14] ss:$8 sps:$4 sm:$0xff] (!%p2277_p13)   ;;  %v1556_v4 = vld [vmem:[#allocation3 + $0x10] ss:$8 sps:$4 sm:$0xff] (!%p2277_p13)   ;;  %v426_v19 = vshrl.u32 (!%p2277_p13), %v425_v18, 7 }
  0x95   : > { %s1312_s14 = sshll.u32 %s397_s20, 1  ;;  %522 = vmatpush1.bf16.msra.mxu0 (!%p2277_p13), %v1553_v1  ;;  %v1557_v5 = vld [vmem:[#allocation3 + $0x24] ss:$8 sps:$4 sm:$0xff] (!%p2277_p13)   ;;  %v1559_v6 = vld [vmem:[#allocation3 + $0x20] ss:$8 sps:$4 sm:$0xff] (!%p2277_p13)  }
  0x96   : > { %s2148_s16 = scalar_lea.vmem %s2238_s4, %s1312_s14  ;;  %523 = vmatprep.subr.bf16.mxu0 (!%p2277_p13), %v1554_v3  ;;  %v1560_v7 = vld [vmem:[#allocation3 + $0x34] ss:$8 sps:$4 sm:$0xff] (!%p2277_p13)   ;;  %v1562_v8 = vld [vmem:[#allocation3 + $0x30] ss:$8 sps:$4 sm:$0xff] (!%p2277_p13)   ;;  %v1563_v9 = vld [vmem:[#allocation3 + $0x44] ss:$8 sps:$4 sm:$0xff] (!%p2277_p13)  }
  0x97   : > { %v1565_v10 = vld [vmem:[#allocation3 + $0x40] ss:$8 sps:$4 sm:$0xff] (!%p2277_p13)   ;;  %v1566_v11 = vld [vmem:[#allocation3 + $0x54] ss:$8 sps:$4 sm:$0xff] (!%p2277_p13)   ;;  %v1568_v12 = vld [vmem:[#allocation3 + $0x50] ss:$8 sps:$4 sm:$0xff] (!%p2277_p13)  }
  0x98   : > { %v1569_v13 = vld [vmem:[#allocation3 + $0x64] ss:$8 sps:$4 sm:$0xff] (!%p2277_p13)   ;;  %v1571_v14 = vld [vmem:[#allocation3 + $0x60] ss:$8 sps:$4 sm:$0xff] (!%p2277_p13)   ;;  %v1572_v15 = vld [vmem:[#allocation3 + $0x74] ss:$8 sps:$4 sm:$0xff] (!%p2277_p13)  }
  0x99   : > { %524 = vmatpush1.bf16.msra.mxu0 (!%p2277_p13), %v1556_v4  ;;  %v1574_v16 = vld [vmem:[#allocation3 + $0x70] ss:$8 sps:$4 sm:$0xff] (!%p2277_p13)   ;;  %v427_v20 = vsub.s32 (!%p2277_p13), 0, %v426_v19  ;;  %v431_v22 = vsub.s32 (!%p2277_p13), 1, %v426_v19 }
  0x9a   : > { %525 = vmatprep.subr.bf16.mxu0 (!%p2277_p13), %v1557_v5  ;;  %v423_v21 = vld [vmem:[%s2236_s2] sm:$0x3] (!%p2277_p13) }
  0x9b   : > { %v428_v23 = vrot.slane %v423_v21, %v427_v20  ;;  %v432_v24 = vrot.slane %v423_v21, %v431_v22 }
  0x9d   : > { %526 = vmatpush1.bf16.msra.mxu0 %v1559_v6 }
  0x9e   : > { %527 = vmatprep.subr.bf16.mxu0 %v1560_v7 }
  0xa1   : > { %528 = vmatpush1.bf16.msra.mxu0 %v1562_v8 }
  0xa2   : > { %529 = vmatprep.subr.bf16.mxu0 %v1563_v9 }
  0xa5   : > { %530 = vmatpush1.bf16.msra.mxu0 %v1565_v10 }
  0xa6   : > { %531 = vmatprep.subr.bf16.mxu0 %v1566_v11 }
  0xa9   : > { %532 = vmatpush1.bf16.msra.mxu0 %v1568_v12 }
  0xaa   : > { %533 = vmatprep.subr.bf16.mxu0 %v1569_v13 }
  0xad   : > { %534 = vmatpush1.bf16.msra.mxu0 %v1571_v14 }
  0xae   : > { %535 = vmatprep.subr.bf16.mxu0 %v1572_v15 }
  0xb1   : > { %536 = vmatpush1.bf16.msra.mxu0 %v1574_v16 }
  0xb4   : > { %554 = vmatmul.mubr.bf16.vlgmr.msra.gmra.mrb[0].mxu0 %v1575_v17 }
 0x187   : > { %v555_v25 = vpop.f32.mrb[0].mxu0 }
 0x188   : > { %v556_v26 = vadd.f32 %v555_v25, %v428_v23  ;;  %v557_v27 = vpop.f32.mrb[1].mxu0 }
 0x189   : > { %v558_v28 = vadd.f32 %v557_v27, %v432_v24  ;;  %v559_v29 = vpop.f32.mrb[2].mxu0 }
 0x18a   : > { %v1331_v30 = vmul.f32 -1.442695, %v556_v26  ;;  %v560_v31 = vadd.f32 %v559_v29, %v428_v23  ;;  %v561_v32 = vpop.f32.mrb[3].mxu0 }
 0x18b   : > { %v1332_v33 = vmul.f32 -1.442695, %v558_v28  ;;  %v562_v34 = vadd.f32 %v561_v32, %v432_v24 }
 0x18c   : > { %1576 = vpow2.f32 %v1331_v30  ;;  %v1333_v35 = vmul.f32 -1.442695, %v560_v31 }
 0x18d   : > { %1578 = vpow2.f32 %v1332_v33  ;;  %v1334_v36 = vmul.f32 -1.442695, %v562_v34 }
 0x18e   : > { %1580 = vpow2.f32 %v1333_v35 }
 0x18f   : > { %1582 = vpow2.f32 %v1334_v36 }
 0x196   : > { %v1577_v37 = vpop.eup %1576 }
 0x197   : > { %v1579_v38 = vpop.eup %1578  ;;  %v576_v39 = vadd.f32 1.0, %v1577_v37 }
 0x198   : > { %v1581_v40 = vpop.eup %1580  ;;  %v577_v41 = vadd.f32 1.0, %v1579_v38 }
 0x199   : > { %v1583_v42 = vpop.eup %1582  ;;  %1584 = vrcp.f32 %v576_v39  ;;  %v578_v43 = vadd.f32 1.0, %v1581_v40 }
 0x19a   : > { %1586 = vrcp.f32 %v577_v41  ;;  %v579_v44 = vadd.f32 1.0, %v1583_v42 }
 0x19b   : > { %1588 = vrcp.f32 %v578_v43 }
 0x19c   : > { %1590 = vrcp.f32 %v579_v44 }
 0x1a3   : > { %v1585_v45 = vpop.eup %1584 }
 0x1a4   : > { %v1587_v46 = vpop.eup %1586  ;;  %v588_v49 = vmul.f32 %v1585_v45, %v556_v26 }
 0x1a5   : > { %v1589_v47 = vpop.eup %1588  ;;  %v589_v51 = vmul.f32 %v1587_v46, %v558_v28 }
 0x1a6   : > { %v1591_v48 = vpop.eup %1590  ;;  %v590_v50 = vmul.f32 %v1589_v47, %v560_v31 }
 0x1a7   : > { %v591_v52 = vmul.f32 %v1591_v48, %v562_v34 }
 0x1a8   : > { %v592_v53 = vpack.c.bf16 %v590_v50, %v588_v49 }
 0x1a9   : > { %v593_v54 = vpack.c.bf16 %v591_v52, %v589_v51 }
 0x1aa   : > { %594 = vst [vmem:[#allocation2] sm:$0xff] %v592_v53 }
 0x1ab   : > { %595 = vst [vmem:[#allocation2 + $0x8] sm:$0xff] %v593_v54 }
 0x1ac PF: > { %v1592_v55 = vld [vmem:[%s2129_s23 + $0x4] ss:$8 sps:$4 sm:$0xff]   ;;  %v1594_v56 = vld [vmem:[%s2129_s23] ss:$8 sps:$4 sm:$0xff]   ;;  %v1595_v57 = vld [vmem:[%s2129_s23 + $0x14] ss:$8 sps:$4 sm:$0xff]   ;;  %v632_v25 = vlaneseq }
 0x1ad   : > { %802 = vmatprep.subr.bf16.mxu0 %v1592_v55  ;;  %v1597_v58 = vld [vmem:[%s2129_s23 + $0x10] ss:$8 sps:$4 sm:$0xff]   ;;  %v1598_v59 = vld [vmem:[%s2129_s23 + $0x24] ss:$8 sps:$4 sm:$0xff]   ;;  %v1600_v60 = vld [vmem:[%s2129_s23 + $0x20] ss:$8 sps:$4 sm:$0xff]  }
 0x1ae   : > { %803 = vmatpush1.bf16.msra.mxu0 %v1594_v56  ;;  %v1601_v61 = vld [vmem:[%s2129_s23 + $0x34] ss:$8 sps:$4 sm:$0xff]   ;;  %v1603_v62 = vld [vmem:[%s2129_s23 + $0x30] ss:$8 sps:$4 sm:$0xff]   ;;  %v1604_v63 = vld [vmem:[%s2129_s23 + $0x44] ss:$8 sps:$4 sm:$0xff]  }
 0x1af   : > { %804 = vmatprep.subr.bf16.mxu0 %v1595_v57  ;;  %v1606_v0 = vld [vmem:[%s2129_s23 + $0x40] ss:$8 sps:$4 sm:$0xff]   ;;  %v1607_v1 = vld [vmem:[%s2129_s23 + $0x54] ss:$8 sps:$4 sm:$0xff]   ;;  %v1609_v2 = vld [vmem:[%s2129_s23 + $0x50] ss:$8 sps:$4 sm:$0xff]  }
 0x1b0   : > { %v1610_v3 = vld [vmem:[%s2129_s23 + $0x64] ss:$8 sps:$4 sm:$0xff]   ;;  %v1612_v5 = vld [vmem:[%s2129_s23 + $0x60] ss:$8 sps:$4 sm:$0xff]   ;;  %v1613_v6 = vld [vmem:[%s2129_s23 + $0x74] ss:$8 sps:$4 sm:$0xff]  }
 0x1b1   : > { %v1615_v7 = vld [vmem:[%s2129_s23 + $0x70] ss:$8 sps:$4 sm:$0xff]   ;;  %v1616_v8 = vld [vmem:[%s2129_s23 + $0x84] ss:$8 sps:$4 sm:$0xff]   ;;  %v1618_v9 = vld [vmem:[%s2129_s23 + $0x80] ss:$8 sps:$4 sm:$0xff]  }
 0x1b2   : > { %805 = vmatpush1.bf16.msra.mxu0 %v1597_v58  ;;  %v597_v4 = vld [vmem:[#allocation2 + $0x8] sm:$0xff]  ;;  %v1622_v12 = vld [vmem:[%s2129_s23 + $0xa4] ss:$8 sps:$4 sm:$0xff]   ;;  %v1624_v13 = vld [vmem:[%s2129_s23 + $0xa0] ss:$8 sps:$4 sm:$0xff]   ;;  %v633_v26 = vshrl.u32 %v632_v25, 7 }
 0x1b3   : > { %806 = vmatprep.subr.bf16.mxu0 %v1598_v59  ;;  %834 = vmatprep.mubr.bf16.mxu0 %v597_v4  ;;  %v1619_v10 = vld [vmem:[%s2129_s23 + $0x94] ss:$8 sps:$4 sm:$0xff]   ;;  %v1621_v11 = vld [vmem:[%s2129_s23 + $0x90] ss:$8 sps:$4 sm:$0xff]   ;;  %v1628_v16 = vld [vmem:[%s2129_s23 + $0xc4] ss:$8 sps:$4 sm:$0xff]  }
 0x1b4   : > { %v1625_v14 = vld [vmem:[%s2129_s23 + $0xb4] ss:$8 sps:$4 sm:$0xff]   ;;  %v1627_v15 = vld [vmem:[%s2129_s23 + $0xb0] ss:$8 sps:$4 sm:$0xff]   ;;  %v1630_v17 = vld [vmem:[%s2129_s23 + $0xc0] ss:$8 sps:$4 sm:$0xff]  }
 0x1b5   : > { %v1631_v18 = vld [vmem:[%s2129_s23 + $0xd4] ss:$8 sps:$4 sm:$0xff]   ;;  %v1633_v19 = vld [vmem:[%s2129_s23 + $0xd0] ss:$8 sps:$4 sm:$0xff]   ;;  %v1634_v20 = vld [vmem:[%s2129_s23 + $0xe4] ss:$8 sps:$4 sm:$0xff]  }
 0x1b6   : > { %807 = vmatpush1.bf16.msra.mxu0 %v1600_v60  ;;  %v1636_v21 = vld [vmem:[%s2129_s23 + $0xe0] ss:$8 sps:$4 sm:$0xff]   ;;  %v1637_v22 = vld [vmem:[%s2129_s23 + $0xf4] ss:$8 sps:$4 sm:$0xff]   ;;  %v1639_v23 = vld [vmem:[%s2129_s23 + $0xf0] ss:$8 sps:$4 sm:$0xff]  }
 0x1b7   : > { %808 = vmatprep.subr.bf16.mxu0 %v1601_v61  ;;  %v596_v24 = vld [vmem:[#allocation2] sm:$0xff]  ;;  %v634_v27 = vsub.s32 0, %v633_v26  ;;  %v638_v29 = vsub.s32 1, %v633_v26  ;;  %p1371_p2 = scmp.ne.s32.totalorder %s1963_s13, 3 }
 0x1b8   : > { %v630_v28 = vld [vmem:[%s2148_s16] sm:$0x3]  ;;  %v1662_v4 = vld [vmem:[#allocation8 + $0x58] sm:$0xff] (!%p1371_p2)   ;;  %vm1890_vm0 = vmmov (!%p1371_p2), 0   ;;  %s2278_s21 = sld [smem:[#allocation20_spill]] (!%p1371_p2)  ;;  %s2279_s5 = sld [smem:[#allocation21_spill]] (!%p1371_p2) }
 0x1b9   : > { %v635_v30 = vrot.slane %v630_v28, %v634_v27  ;;  %v639_v31 = vrot.slane %v630_v28, %v638_v29 }
 0x1ba   : > { %809 = vmatpush1.bf16.msra.mxu0 %v1603_v62  ;;  %v1656_v62 = vld [vmem:[#allocation8 + $0x40] sm:$0xff] (!%p1371_p2)  }
 0x1bb   : > { %810 = vmatprep.subr.bf16.mxu0 %v1604_v63  ;;  %v1657_v63 = vld [vmem:[#allocation8] sm:$0xff] (!%p1371_p2)  }
 0x1be   : > { %811 = vmatpush1.bf16.msra.mxu0 %v1606_v0  ;;  %v1658_v0 = vld [vmem:[#allocation8 + $0x48] sm:$0xff] (!%p1371_p2)   ;;  %v1372_v26 = vld [vmem:[%s2278_s21] ss:$0 sm:$0xff] (!%p1371_p2) }
 0x1bf   : > { %812 = vmatprep.subr.bf16.mxu0 %v1607_v1  ;;  %v1659_v1 = vld [vmem:[#allocation8 + $0x8] sm:$0xff] (!%p1371_p2)  }
 0x1c2   : > { %813 = vmatpush1.bf16.msra.mxu0 %v1609_v2  ;;  %v1660_v2 = vld [vmem:[#allocation8 + $0x50] sm:$0xff] (!%p1371_p2)  }
 0x1c3   : > { %814 = vmatprep.subr.bf16.mxu0 %v1610_v3  ;;  %v1661_v3 = vld [vmem:[#allocation8 + $0x10] sm:$0xff] (!%p1371_p2)  }
 0x1c6   : > { %815 = vmatpush1.bf16.msra.mxu0 %v1612_v5  ;;  %v1663_v5 = vld [vmem:[#allocation8 + $0x18] sm:$0xff] (!%p1371_p2)  }
 0x1c7   : > { %816 = vmatprep.subr.bf16.mxu0 %v1613_v6  ;;  %v1664_v6 = vld [vmem:[#allocation8 + $0x60] sm:$0xff] (!%p1371_p2)  }
 0x1ca   : > { %817 = vmatpush1.bf16.msra.mxu0 %v1615_v7  ;;  %v1665_v7 = vld [vmem:[#allocation8 + $0x20] sm:$0xff] (!%p1371_p2)  }
 0x1cb   : > { %818 = vmatprep.subr.bf16.mxu0 %v1616_v8  ;;  %v1666_v8 = vld [vmem:[#allocation8 + $0x68] sm:$0xff] (!%p1371_p2)  }
 0x1ce   : > { %819 = vmatpush1.bf16.msra.mxu0 %v1618_v9 }
 0x1cf   : > { %820 = vmatprep.subr.bf16.mxu0 %v1619_v10  ;;  %v1667_v10 = vld [vmem:[#allocation8 + $0x28] sm:$0xff] (!%p1371_p2)  }
 0x1d2   : > { %821 = vmatpush1.bf16.msra.mxu0 %v1621_v11  ;;  %v1668_v11 = vld [vmem:[#allocation8 + $0x70] sm:$0xff] (!%p1371_p2)  }
 0x1d3   : > { %822 = vmatprep.subr.bf16.mxu0 %v1622_v12  ;;  %v1669_v12 = vld [vmem:[#allocation8 + $0x30] sm:$0xff] (!%p1371_p2)  }
 0x1d6   : > { %823 = vmatpush1.bf16.msra.mxu0 %v1624_v13  ;;  %v1670_v13 = vld [vmem:[#allocation8 + $0x78] sm:$0xff] (!%p1371_p2)  }
 0x1d7   : > { %824 = vmatprep.subr.bf16.mxu0 %v1625_v14  ;;  %v1671_v14 = vld [vmem:[#allocation8 + $0x38] sm:$0xff] (!%p1371_p2)  }
 0x1da   : > { %825 = vmatpush1.bf16.msra.mxu0 %v1627_v15 }
 0x1db   : > { %826 = vmatprep.subr.bf16.mxu0 %v1628_v16  ;;  %v1672_v16 = vld [vmem:[#allocation9] sm:$0xff] (!%p1371_p2)  }
 0x1de   : > { %827 = vmatpush1.bf16.msra.mxu0 %v1630_v17  ;;  %v1889_v17 = vmov (!%p1371_p2), 0.0  }
 0x1df   : > { %828 = vmatprep.subr.bf16.mxu0 %v1631_v18  ;;  %1445 = vmatprep.subr.bf16.mxu1 (!%p1371_p2), %v1889_v17  ;;  %v1673_v18 = vld [vmem:[#allocation9 + $0x8] sm:$0xff] (!%p1371_p2)  }
 0x1e0   : > { %1446 = vmatpush3.bf16.msra.mxu1 (!%p1371_p2), %v1672_v16  ;;  %1461 = vmatprep.mubr.msk.bf16.mxu1 (!%p1371_p2), %vm1890_vm0, %v1889_v17 }
 0x1e1   : > { %1447 = vmatprep.subr.bf16.mxu1 (!%p1371_p2), %v1889_v17 }
 0x1e2   : > { %829 = vmatpush1.bf16.msra.mxu0 %v1633_v19  ;;  %v1674_v19 = vld [vmem:[#allocation9 + $0x10] sm:$0xff] (!%p1371_p2)  }
 0x1e3   : > { %830 = vmatprep.subr.bf16.mxu0 %v1634_v20  ;;  %v1675_v20 = vld [vmem:[#allocation9 + $0x18] sm:$0xff] (!%p1371_p2)  }
 0x1e4   : > { %1448 = vmatpush3.bf16.msra.mxu1 (!%p1371_p2), %v1673_v18 }
 0x1e5   : > { %1449 = vmatprep.subr.bf16.mxu1 (!%p1371_p2), %v1889_v17 }
 0x1e6   : > { %831 = vmatpush1.bf16.msra.mxu0 %v1636_v21  ;;  %v1676_v21 = vld [vmem:[#allocation9 + $0x20] sm:$0xff] (!%p1371_p2)  }
 0x1e7   : > { %832 = vmatprep.subr.bf16.mxu0 %v1637_v22  ;;  %v1677_v22 = vld [vmem:[#allocation9 + $0x28] sm:$0xff] (!%p1371_p2)  }
 0x1e8   : > { %1450 = vmatpush3.bf16.msra.mxu1 (!%p1371_p2), %v1674_v19 }
 0x1e9   : > { %1451 = vmatprep.subr.bf16.mxu1 (!%p1371_p2), %v1889_v17 }
 0x1ea   : > { %833 = vmatpush1.bf16.msra.mxu0 %v1639_v23  ;;  %v1678_v23 = vld [vmem:[#allocation9 + $0x30] sm:$0xff] (!%p1371_p2)  }
 0x1eb   : > { %1414 = vmatprep.subr.bf16.mxu0 (!%p1371_p2), %v1656_v62 }
 0x1ec   : > { %1452 = vmatpush3.bf16.msra.mxu1 (!%p1371_p2), %v1675_v20 }
 0x1ed   : > { %835 = vmatmul.mubr.bf16.vlgmr.msra.gmra.mrb[0].mxu0 %v596_v24  ;;  %1453 = vmatprep.subr.bf16.mxu1 (!%p1371_p2), %v1889_v17  ;;  %v1679_v24 = vld [vmem:[#allocation9 + $0x38] sm:$0xff] (!%p1371_p2)  }
 0x1ee   : > { %1415 = vmatpush3.bf16.msra.mxu0 (!%p1371_p2), %v1657_v63 }
 0x1ef   : > { %1416 = vmatprep.subr.bf16.mxu0 (!%p1371_p2), %v1658_v0 }
 0x1f0   : > { %1454 = vmatpush3.bf16.msra.mxu1 (!%p1371_p2), %v1676_v21 }
 0x1f1   : > { %1455 = vmatprep.subr.bf16.mxu1 (!%p1371_p2), %v1889_v17 }
 0x1f2   : > { %1417 = vmatpush3.bf16.msra.mxu0 (!%p1371_p2), %v1659_v1 }
 0x1f3   : > { %1418 = vmatprep.subr.bf16.mxu0 (!%p1371_p2), %v1660_v2 }
 0x1f4   : > { %1456 = vmatpush3.bf16.msra.mxu1 (!%p1371_p2), %v1677_v22 }
 0x1f5   : > { %1457 = vmatprep.subr.bf16.mxu1 (!%p1371_p2), %v1889_v17 }
 0x1f6   : > { %1419 = vmatpush3.bf16.msra.mxu0 (!%p1371_p2), %v1661_v3 }
 0x1f7   : > { %1420 = vmatprep.subr.bf16.mxu0 (!%p1371_p2), %v1662_v4 }
 0x1f8   : > { %1458 = vmatpush3.bf16.msra.mxu1 (!%p1371_p2), %v1678_v23 }
 0x1f9   : > { %1459 = vmatprep.subr.bf16.mxu1 (!%p1371_p2), %v1889_v17 }
 0x1fa   : > { %1421 = vmatpush3.bf16.msra.mxu0 (!%p1371_p2), %v1663_v5 }
 0x1fb   : > { %1422 = vmatprep.subr.bf16.mxu0 (!%p1371_p2), %v1664_v6 }
 0x1fc   : > { %1460 = vmatpush3.bf16.msra.mxu1 (!%p1371_p2), %v1679_v24 }
 0x1fe   : > { %1423 = vmatpush3.bf16.msra.mxu0 (!%p1371_p2), %v1665_v7 }
 0x1ff   : > { %1424 = vmatprep.subr.bf16.mxu0 (!%p1371_p2), %v1666_v8 }
 0x202   : > { %1425 = vmatpush3.bf16.msra.mxu0 (!%p1371_p2), %v1667_v10 }
 0x203   : > { %1426 = vmatprep.subr.bf16.mxu0 (!%p1371_p2), %v1668_v11 }
 0x206   : > { %1427 = vmatpush3.bf16.msra.mxu0 (!%p1371_p2), %v1669_v12 }
 0x207   : > { %1428 = vmatprep.subr.bf16.mxu0 (!%p1371_p2), %v1670_v13 }
 0x20a   : > { %1429 = vmatpush3.bf16.msra.mxu0 (!%p1371_p2), %v1671_v14 }
 0x2c0   : > { %v836_v32 = vpop.f32.mrb[0].mxu0 }
 0x2c1   : > { %v837_v33 = vadd.f32 %v836_v32, %v635_v30  ;;  %v838_v34 = vpop.f32.mrb[1].mxu0 }
 0x2c2   : > { %v839_v35 = vadd.f32 %v838_v34, %v639_v31  ;;  %v840_v36 = vpop.f32.mrb[2].mxu0 }
 0x2c3   : > { %v1367_v37 = vmul.f32 -1.442695, %v837_v33  ;;  %v841_v38 = vadd.f32 %v840_v36, %v635_v30  ;;  %v842_v39 = vpop.f32.mrb[3].mxu0 }
 0x2c4   : > { %v1368_v40 = vmul.f32 -1.442695, %v839_v35  ;;  %v843_v41 = vadd.f32 %v842_v39, %v639_v31 }
 0x2c5   : > { %1640 = vpow2.f32 %v1367_v37  ;;  %v1369_v42 = vmul.f32 -1.442695, %v841_v38 }
 0x2c6   : > { %1642 = vpow2.f32 %v1368_v40  ;;  %v1370_v43 = vmul.f32 -1.442695, %v843_v41 }
 0x2c7   : > { %1644 = vpow2.f32 %v1369_v42 }
 0x2c8   : > { %1646 = vpow2.f32 %v1370_v43 }
 0x2cf   : > { %v1641_v44 = vpop.eup %1640 }
 0x2d0   : > { %v1643_v45 = vpop.eup %1642  ;;  %v857_v46 = vadd.f32 1.0, %v1641_v44 }
 0x2d1   : > { %v1645_v47 = vpop.eup %1644  ;;  %v858_v48 = vadd.f32 1.0, %v1643_v45  ;;  %v1391_v45 = vld [vmem:[%s2279_s5] ss:$0 sm:$0xff] (!%p1371_p2) }
 0x2d2   : > { %v1647_v49 = vpop.eup %1646  ;;  %1648 = vrcp.f32 %v857_v46  ;;  %v859_v50 = vadd.f32 1.0, %v1645_v47 }
 0x2d3   : > { %1650 = vrcp.f32 %v858_v48  ;;  %v860_v51 = vadd.f32 1.0, %v1647_v49 }
 0x2d4   : > { %1652 = vrcp.f32 %v859_v50 }
 0x2d5   : > { %1654 = vrcp.f32 %v860_v51 }
 0x2dc   : > { %v1649_v52 = vpop.eup %1648 }
 0x2dd   : > { %v1651_v53 = vpop.eup %1650  ;;  %v869_v56 = vmul.f32 %v1649_v52, %v837_v33 }
 0x2de   : > { %v1653_v54 = vpop.eup %1652  ;;  %v870_v58 = vmul.f32 %v1651_v53, %v839_v35  ;;  %880 = sbr.rel (%p1371_p2) target bundleno = 1217 (0x4c1), region = 80 }
 0x2df   : > { %v1655_v55 = vpop.eup %1654  ;;  %v871_v57 = vmul.f32 %v1653_v54, %v841_v38 }
 0x2e0   : > { %v872_v59 = vmul.f32 %v1655_v55, %v843_v41 }
 0x2e1   : > { %v873_v60 = vpack.c.bf16 %v871_v57, %v869_v56 }
 0x2e2   : > { %v874_v61 = vpack.c.bf16 %v872_v59, %v870_v58 }
 0x2e3   : > { %875 = vst [vmem:[#allocation2] sm:$0xff] %v873_v60 }
 0x2e4   : > { %876 = vst [vmem:[#allocation2 + $0x8] sm:$0xff] %v874_v61 }
 0x2ea   : > { %v881_v15 = vld [vmem:[#allocation2] sm:$0xff] }
 0x2eb   : > { %v882_v9 = vld [vmem:[#allocation2 + $0x8] sm:$0xff] }
 0x2ec   : > { %1050 = vmatprep.mubr.bf16.mxu0 %v882_v9 }
 0x2ed   : > { %1051 = vmatmul.mubr.bf16.vlgmr.msra.gmra.mrb[0].mxu0 %v881_v15 }
 0x3c0   : > { %v1430_v25 = vpop.f32.mrb[0].mxu0 }
 0x3c1   : > { %v1431_v27 = vpop.f32.mrb[1].mxu0 }
 0x3c2   : > { %v1432_v28 = vadd.f32 %v1431_v27, %v1430_v25  ;;  %v1433_v29 = vpop.f32.mrb[2].mxu0 }
 0x3c3   : > { %v1434_v30 = vpop.f32.mrb[3].mxu0 }
 0x3c4   : > { %v1053_v31 = vadd.f32 %v1432_v28, %v1372_v26  ;;  %v1435_v32 = vadd.f32 %v1434_v30, %v1433_v29 }
 0x3c6   : > { %v1389_v33 = vmul.f32 -1.442695, %v1053_v31  ;;  %v1056_v34 = vadd.f32 %v1435_v32, %v1372_v26 }
 0x3c8   : > { %1680 = vpow2.f32 %v1389_v33  ;;  %v1390_v35 = vmul.f32 -1.442695, %v1056_v34 }
 0x3ca   : > { %1682 = vpow2.f32 %v1390_v35 }
 0x3d2   : > { %v1681_v36 = vpop.eup %1680 }
 0x3d3   : > { %v1065_v37 = vadd.f32 1.0, %v1681_v36 }
 0x3d4   : > { %v1683_v38 = vpop.eup %1682 }
 0x3d5   : > { %1684 = vrcp.f32 %v1065_v37  ;;  %v1066_v39 = vadd.f32 1.0, %v1683_v38 }
 0x3d7   : > { %1686 = vrcp.f32 %v1066_v39 }
 0x3df   : > { %v1685_v40 = vpop.eup %1684 }
 0x3e0   : > { %v1071_v42 = vmul.f32 %v1685_v40, %v1053_v31 }
 0x3e1   : > { %v1687_v41 = vpop.eup %1686 }
 0x3e2   : > { %v1072_v43 = vmul.f32 %v1687_v41, %v1056_v34 }
 0x3e4   : > { %v1073_v44 = vpack.c.bf16 %v1072_v43, %v1071_v42 }
 0x3e6   : > { %1462 = vmatmul.mubr.bf16.vlgmr.msra.gmra.mrb[0].mxu1 %v1073_v44 }
 0x4b9   : > { %v1179_v46 = vpop.f32.mrb[0].mxu1 }
 0x4ba   : > { %v1463_v47 = vpop.f32.mrb[1].mxu1  ;;  %v1180_v49 = vadd.f32 %v1391_v45, %v1179_v46 }
 0x4bb   : > { %v1182_v48 = vpop.f32.mrb[2].mxu1 }
 0x4bc   : > { %v1183_v50 = vadd.f32 %v1391_v45, %v1182_v48  ;;  %v1464_v51 = vpop.f32.mrb[3].mxu1 }
 0x4be   : > { %v1412_v52 = vpack.c.bf16 %v1183_v50, %v1180_v49 }
 0x4c0   : > { %1413 = vst [vmem:[#allocation11] sm:$0xff] %v1412_v52  }
 0x4c1 PF: > { %p1504_p8 = scmp.eq.s32.totalorder %s1963_s13, 3  ;;  %s1891_s6 = smov [#allocation11]  }
 0x4c2   : > { %s1202_s30 = sshll.u32 %s1891_s6, 4  ;;  %s1203_s30 = int_to_ptr.vmem [resolvable:$true] %s1202_s30 }
 0x4c3   : > { %s1802_s24 = scalar_lea.vmem %s1203_s30, 128  ;;  %p1809_p9 = scmp.lt.s32.totalorder %s1203_s30, %s1203_s30 }
 0x4c4   : > { %p1803_p10 = scmp.ne.s32.totalorder %s1203_s30, %s1802_s24  ;;  %p1810_p1 = scmp.lt.s32.totalorder %s1802_s24, %s1802_s24 }
 0x4c6   : > { %p1804_p0 = pnand %p1803_p10, %p1504_p8  ;;  %p1811_p3 = por %p1810_p1, %p1809_p9 }
 0x4c8   : > { %p1805_p5 = pneg %p1804_p0 }
 0x4ca   : > { %p1812_p12 = pnand %p1811_p3, %p1805_p5 }
 0x4cc   : > { %1815 = shalt.err (!%p1812_p12)
}
 0x4cd   : > { %s2280_s27 = sld [smem:[#allocation22_spill]] }
 0x4d3   : > { %s1816_s23 = scalar_lea.hbm %s2280_s27, 128 }
 0x4d4   : > { %p1817_p4 = scmp.ne.s32.totalorder %s2280_s27, %s1816_s23  ;;  %p1822_p11 = scmp.lt.u32.totalorder %s1816_s23, %s2280_s27 }
 0x4d6   : > { %p1818_p6 = pnand %p1817_p4, %p1504_p8 }
 0x4d8   : > { %p1819_p7 = pneg %p1818_p6 }
 0x4da   : > { %p1824_p13 = pnand %p1822_p11, %p1819_p7 }
 0x4dc   : > { %1827 = shalt.err (!%p1824_p13)
}
 0x4dd   : > { %s1892_s16 = smov 64   ;;  %s1893_s18 = smov 4  }
 0x4de   : > { %1480 = dma.vmem_to_hbm [thread:$0]  (%p1504_p8), %s1203_s30, 128, %s2280_s27, [#allocation5], %s1892_s16, %s1892_s16, %s1893_s18  }
 0x4df   : > { %1861 = dma.done.wait (%p1504_p8), [#allocation5], 128  }
 0x4e0   : > { %1863 = vsyncadd (%p1504_p8), [#allocation5], 4294967168 }
 0x4e1 PF: > { %s2281_s12 = sld [smem:[#allocation17_spill]]  ;;  %s2282_s28 = sld [smem:[#allocation18_spill]] }
 0x4e2   : > { %s2283_s30 = smov %s1870_s10  ;;  %s2284_s10 = smov %s1874_s11 }
 0x4e7   : > { %p22_p2 = scmp.ge.s32.totalorder %s2281_s12, 6   ;;  %s2285_s11 = smov %s2282_s28 }
 0x4e9   :  { %24 = sbr.rel (!%p22_p2) target bundleno = 11 (0xb), region = 117 }
 0x4f0   :  { %1218 = vsyncpa [#allocation4], 1 }
 0x4f1   :  { %1220 = vsyncpa [#allocation4 + $0x1], 1 }
 0x4f2   :  { %1221 = vsyncpa [#allocation7], 1 }
 0x4f3   :  { %1223 = vsyncpa [#allocation7 + $0x1], 1 }
 0x4f4   :  { %1224 = vsyncpa [#allocation10], 1 }
 0x4f5   :  { %1225 = vsyncpa [#allocation5], 1 }
 0x4f6   :  { %1227 = vsyncpa [#allocation5 + $0x1], 1 }

</bundles_post_ra>
